<compile_context>
chip_gen: v5e
topology: v5e:2x2
jax: 0.10.0
libtpu: 0.0.40
codegen_flags: <defaults>
</compile_context>

<pallas_src>
import functools

import jax
import jax.numpy as jnp
from jax.experimental import pallas as pl
from jax.experimental.pallas import tpu as pltpu


def _round_up(x, m):
    return ((x + m - 1) // m) * m


# ---------------------------------------------------------------------------
# Kernel body
# ---------------------------------------------------------------------------
def _sae_kernel(x_ref, w_enc_ref, b_enc_ref, thr_ref, w_dec_ref, b_dec_ref,
                o_ref, acc_ref):
    k = pl.program_id(1)

    @pl.when(k == 0)
    def _():
        # Fold b_dec into the accumulator init: saves one (tm, d_model) f32
        # zero-fill store pass and one epilogue VPU add per token tile.
        acc_ref[...] = jnp.broadcast_to(b_dec_ref[...], acc_ref.shape)

    # Encode slab: (tm, ts) pre-activations, f32 accumulation on the MXU.
    pre = jnp.dot(x_ref[...], w_enc_ref[...],
                  preferred_element_type=jnp.float32) + b_enc_ref[...]
    # JumpReLU gate (threshold pre-clamped to >= 0 in the wrapper):
    #   (pre > thr) * relu(pre) == where(pre > max(thr, 0), pre, 0)
    gated = jnp.where(pre > thr_ref[...], pre, 0.0)
    # Partial decode: this d_sae slab's contribution to the reconstruction.
    acc_ref[...] += jnp.dot(gated.astype(w_dec_ref.dtype), w_dec_ref[...],
                            preferred_element_type=jnp.float32)

    @pl.when(k == pl.num_programs(1) - 1)
    def _():
        o_ref[...] = acc_ref[...].astype(o_ref.dtype)


# ---------------------------------------------------------------------------
# Hardware-aware configuration
# ---------------------------------------------------------------------------
def _hw_config():
    """Returns (vmem_capacity_bytes, default_tm, default_ts, dual_core)."""
    vmem_cap = 64 << 20  # conservative fallback (v7x per-TC physical VMEM)
    try:
        vmem_cap = int(pltpu.get_tpu_info().vmem_capacity_bytes)
    except Exception:
        pass
    kind = ""
    try:
        kind = jax.devices()[0].device_kind.lower()
    except Exception:
        pass
    dual_core = ("v7" in kind) or ("7x" in kind)
    if "v6" in kind:
        tm, ts = 1024, 512   # ridge ~650-700 FLOP/B on the weight stream
    elif "v5" in kind:
        tm, ts = 512, 512    # ridge ~240 FLOP/B
    else:
        tm, ts = 512, 512    # v7x (ridge ~310 FLOP/B) / unknown: safe for 64 MiB
    return vmem_cap, tm, ts, dual_core


def _vmem_estimate(tm, ts, dm, x_item, w_item, out_item):
    return (2 * tm * dm * x_item          # x tile (double-buffered)
            + 2 * dm * ts * w_item        # W_enc slab
            + 2 * ts * dm * w_item        # W_dec slab
            + 2 * tm * dm * out_item      # output tile
            + tm * dm * 4                 # f32 accumulator scratch
            + 2 * tm * ts * 4             # pre / gated slabs
            + 4 * ts * 4 + 2 * dm * 4)    # biases / threshold


# ---------------------------------------------------------------------------
# Pallas call (jit'd inner)
# ---------------------------------------------------------------------------
@functools.partial(
    jax.jit,
    static_argnames=("tm_eff", "ts_eff", "vmem_limit", "compute_dtype"))
def _forward_impl(x2, w_enc, w_dec, threshold, b_enc, b_dec, *,
                  tm_eff, ts_eff, vmem_limit, compute_dtype):
    out_dtype = x2.dtype
    T, d_model = x2.shape
    d_sae = w_enc.shape[1]

    if compute_dtype is not None:
        x2 = x2.astype(compute_dtype)
        w_enc = w_enc.astype(compute_dtype)
        w_dec = w_dec.astype(compute_dtype)

    T_pad = _round_up(T, tm_eff)
    d_sae_pad = _round_up(d_sae, ts_eff)
    d_model_pad = _round_up(d_model, 128)   # lane-dense output / clean MXU K,N

    # ---- padding (padded rows/cols/features provably contribute 0) ----------
    if T_pad != T:
        x2 = jnp.pad(x2, ((0, T_pad - T), (0, 0)))
    if d_model_pad != d_model:
        pad_m = d_model_pad - d_model
        x2 = jnp.pad(x2, ((0, 0), (0, pad_m)))
        w_enc = jnp.pad(w_enc, ((0, pad_m), (0, 0)))
        w_dec = jnp.pad(w_dec, ((0, 0), (0, pad_m)))
        b_dec = jnp.pad(b_dec, (0, pad_m))
    if d_sae_pad != d_sae:
        pad_f = d_sae_pad - d_sae
        w_enc = jnp.pad(w_enc, ((0, 0), (0, pad_f)))
        w_dec = jnp.pad(w_dec, ((0, pad_f), (0, 0)))
        b_enc = jnp.pad(b_enc, (0, pad_f))
        threshold = jnp.pad(threshold, (0, pad_f))

    # Clamp once so the in-kernel gate is a single compare+select.
    thr_eff = jnp.maximum(threshold, 0.0)

    b_enc2 = b_enc.reshape(1, d_sae_pad).astype(jnp.float32)
    thr2 = thr_eff.reshape(1, d_sae_pad).astype(jnp.float32)
    b_dec2 = b_dec.reshape(1, d_model_pad).astype(jnp.float32)

    n_i = T_pad // tm_eff      # token tiles  (parallel, outer)
    n_k = d_sae_pad // ts_eff  # d_sae tiles  (arbitrary, inner -> accumulation)

    out = pl.pallas_call(
        _sae_kernel,
        out_shape=jax.ShapeDtypeStruct((T_pad, d_model_pad), out_dtype),
        grid_spec=pltpu.PrefetchScalarGridSpec(
            num_scalar_prefetch=0,
            grid=(n_i, n_k),
            in_specs=[
                pl.BlockSpec((tm_eff, d_model_pad), lambda i, k: (i, 0)),  # x tile
                pl.BlockSpec((d_model_pad, ts_eff), lambda i, k: (0, k)),  # W_enc slab
                pl.BlockSpec((1, ts_eff), lambda i, k: (0, k)),            # b_enc slab
                pl.BlockSpec((1, ts_eff), lambda i, k: (0, k)),            # threshold slab
                pl.BlockSpec((ts_eff, d_model_pad), lambda i, k: (k, 0)),  # W_dec slab
                pl.BlockSpec((1, d_model_pad), lambda i, k: (0, 0)),       # b_dec
            ],
            out_specs=pl.BlockSpec((tm_eff, d_model_pad), lambda i, k: (i, 0)),
            scratch_shapes=[pltpu.VMEM((tm_eff, d_model_pad), jnp.float32)],
        ),
        compiler_params=pltpu.CompilerParams(
            dimension_semantics=("parallel", "arbitrary"),
            vmem_limit_bytes=vmem_limit,
        ),
    )(x2, w_enc, b_enc2, thr2, w_dec, b_dec2)

    return out[:T, :d_model]


# ---------------------------------------------------------------------------
# Public wrapper (resolves per-generation tiling on the host)
# ---------------------------------------------------------------------------
def jumprelu_sae_forward(x, w_enc, w_dec, threshold, b_enc, b_dec, *,
                         tm=None, ts=None, compute_dtype=jnp.bfloat16):
    """x: (..., d_model) -> JumpReLU-SAE reconstruction (..., d_model).

    compute_dtype: dtype of x / W_enc / W_dec fed to the MXU. bf16 (default,
      recommended on v5e / v6e / v7x) halves the weight HBM stream; gating,
      biases and accumulation stay f32. Pass None for full-f32 operands
      (bit-for-bit vs the pure-JAX reference).
    tm / ts: token-tile rows / d_sae tile width. Defaults are picked per TPU
      generation and auto-shrunk until the working set fits VMEM.
    """
    orig_shape = x.shape
    d_model = orig_shape[-1]
    d_sae = w_enc.shape[1]
    x2 = x.reshape(-1, d_model)
    T = x2.shape[0]

    vmem_cap, tm_default, ts_default, dual_core = _hw_config()
    tm = tm_default if tm is None else tm
    ts = ts_default if ts is None else ts

    x_item = (jnp.dtype(compute_dtype).itemsize if compute_dtype is not None
              else jnp.dtype(x2.dtype).itemsize)
    w_item = (jnp.dtype(compute_dtype).itemsize if compute_dtype is not None
              else jnp.dtype(w_enc.dtype).itemsize)
    out_item = jnp.dtype(x2.dtype).itemsize
    sub = {4: 8, 2: 16, 1: 32}.get(x_item, 8)          # sublane packing granule
    d_model_pad = _round_up(d_model, 128)

    tm_eff = min(_round_up(tm, sub), _round_up(T, sub))
    ts_eff = min(_round_up(ts, 128), _round_up(d_sae, 128))

    # v7x: keep the 'parallel' token axis split across the two TensorCores.
    if dual_core and T > sub:
        half = max(sub, _round_up(-(-T // 2), sub))
        tm_eff = min(tm_eff, half)

    # Shrink tiles until the double-buffered working set fits ~85% of VMEM.
    budget = int(vmem_cap * 0.85)
    while _vmem_estimate(tm_eff, ts_eff, d_model_pad,
                         x_item, w_item, out_item) > budget:
        if ts_eff > 256:
            ts_eff = max(128, _round_up(ts_eff // 2, 128))
        elif tm_eff > 4 * sub:
            tm_eff = max(sub, _round_up(tm_eff // 2, sub))
        else:
            break

    vmem_est = _vmem_estimate(tm_eff, ts_eff, d_model_pad,
                              x_item, w_item, out_item)
    vmem_limit = int(min(vmem_cap, max(budget, vmem_est)))

    out = _forward_impl(x2, w_enc, w_dec, threshold, b_enc, b_dec,
                        tm_eff=int(tm_eff), ts_eff=int(ts_eff),
                        vmem_limit=vmem_limit, compute_dtype=compute_dtype)
    return out.reshape(orig_shape)


def _reference_forward(x, w_enc, w_dec, threshold, b_enc, b_dec):
    pre = x @ w_enc + b_enc
    acts = jnp.where(pre > threshold, jnp.maximum(pre, 0.0), 0.0)
    return acts @ w_dec + b_dec


if __name__ == "__main__":
    # Small shapes consistent with the module: tokens = batch*seq, d_model/d_sae.
    batch, seq, d_model, d_sae = 2, 8, 32, 64

    key = jax.random.PRNGKey(0)
    kx, ke, kd, kt, kbe, kbd = jax.random.split(key, 6)

    # Deterministic synthetic parameters (module __init__ uses zeros; small
    # random values so the JumpReLU gate is actually exercised, incl. negative
    # thresholds to cover the max(thr, 0) simplification).
    x = jax.random.normal(kx, (batch, seq, d_model), dtype=jnp.float32)
    W_enc = 0.1 * jax.random.normal(ke, (d_model, d_sae), dtype=jnp.float32)
    W_dec = 0.1 * jax.random.normal(kd, (d_sae, d_model), dtype=jnp.float32)
    threshold = 0.05 * jax.random.normal(kt, (d_sae,), dtype=jnp.float32)
    b_enc = 0.05 * jax.random.normal(kbe, (d_sae,), dtype=jnp.float32)
    b_dec = 0.05 * jax.random.normal(kbd, (d_model,), dtype=jnp.float32)

    ref = _reference_forward(x, W_enc, W_dec, threshold, b_enc, b_dec)

    # f32 operand path: bit-for-bit close to the pure-JAX reference.
    recon_f32 = jumprelu_sae_forward(x, W_enc, W_dec, threshold, b_enc, b_dec,
                                     compute_dtype=None)
    recon_f32 = jax.block_until_ready(recon_f32)
    assert recon_f32.shape == x.shape and recon_f32.dtype == x.dtype
    assert jnp.allclose(recon_f32, ref, atol=1e-5, rtol=1e-5), "f32 mismatch vs reference"

    # Default (bf16 matmul operands, production setting): loose tolerance.
    recon = jumprelu_sae_forward(x, W_enc, W_dec, threshold, b_enc, b_dec)
    recon = jax.block_until_ready(recon)
    assert recon.shape == x.shape and recon.dtype == x.dtype
    assert jnp.allclose(recon, ref, atol=1e-1, rtol=1e-1), "bf16 path diverged"

    print("KERNEL_OK")
</pallas_src>

<mosaic_0001>
module attributes {stable_mosaic.version = 11 : i64} {
  func.func @_sae_kernel(%arg0: i32, %arg1: i32, %arg2: memref<16x128xf32, #tpu.memory_space<vmem>>, %arg3: memref<128x128xf32, #tpu.memory_space<vmem>>, %arg4: memref<1x128xf32, #tpu.memory_space<vmem>>, %arg5: memref<1x128xf32, #tpu.memory_space<vmem>>, %arg6: memref<128x128xf32, #tpu.memory_space<vmem>>, %arg7: memref<1x128xf32, #tpu.memory_space<vmem>>, %arg8: memref<16x128xf32, #tpu.memory_space<vmem>>, %arg9: memref<16x128xf32, #tpu.memory_space<vmem>>) attributes {dimension_semantics = [#tpu.dimension_semantics<parallel>, #tpu.dimension_semantics<arbitrary>], iteration_bounds = array<i64: 1, 1>, scalar_prefetch = 0 : i64, scratch_operands = 1 : i64, tpu.core_type = #tpu.core_type<tc>, window_params = [{transform_indices = @transform_0, window_bounds = array<i64: 16, 128>}, {transform_indices = @transform_1, window_bounds = array<i64: 128, 128>}, {transform_indices = @transform_2, window_bounds = array<i64: 1, 128>}, {transform_indices = @transform_3, window_bounds = array<i64: 1, 128>}, {transform_indices = @transform_4, window_bounds = array<i64: 128, 128>}, {pipeline_mode = #tpu.pipeline_mode<synchronous>, transform_indices = @transform_5, window_bounds = array<i64: 1, 128>}, {transform_indices = @transform_6, window_bounds = array<i64: 16, 128>}]} {
    %c0_i32 = arith.constant 0 : i32
    %0 = arith.cmpi eq, %arg1, %c0_i32 : i32
    %1 = arith.extui %0 : i1 to i32
    %c0_i32_0 = arith.constant 0 : i32
    %2 = arith.cmpi ne, %1, %c0_i32_0 : i32
    scf.if %2 {
      %c0_18 = arith.constant 0 : index
      %c0_19 = arith.constant 0 : index
      %22 = vector.load %arg7[%c0_18, %c0_19] : memref<1x128xf32, #tpu.memory_space<vmem>>, vector<1x128xf32>
      %23 = vector.shape_cast %22 : vector<1x128xf32> to vector<1x128xf32>
      %24 = vector.broadcast %23 : vector<1x128xf32> to vector<16x128xf32>
      %c0_20 = arith.constant 0 : index
      %c0_21 = arith.constant 0 : index
      %25 = vector.load %arg9[%c0_20, %c0_21] : memref<16x128xf32, #tpu.memory_space<vmem>>, vector<16x128xf32>
      tpu.vector_store %arg9[%c0_20, %c0_21], %24 {strides = array<i32>} : memref<16x128xf32, #tpu.memory_space<vmem>>, vector<16x128xf32>,
    } else {
    }
    %c0 = arith.constant 0 : index
    %c0_1 = arith.constant 0 : index
    %3 = vector.load %arg2[%c0, %c0_1] : memref<16x128xf32, #tpu.memory_space<vmem>>, vector<16x128xf32>
    %c0_2 = arith.constant 0 : index
    %c0_3 = arith.constant 0 : index
    %4 = vector.load %arg3[%c0_2, %c0_3] : memref<128x128xf32, #tpu.memory_space<vmem>>, vector<128x128xf32>
    %cst = arith.constant dense<0.000000e+00> : vector<16x128xf32>
    %5 = tpu.matmul %3, %4, %cst {dimension_numbers = #tpu.dot_dimension_numbers<[1], [0], [0], [1], [0, 0, 1, 1], [], []>} : vector<16x128xf32>, vector<128x128xf32>, vector<16x128xf32> -> vector<16x128xf32>
    %c0_4 = arith.constant 0 : index
    %c0_5 = arith.constant 0 : index
    %6 = vector.load %arg4[%c0_4, %c0_5] : memref<1x128xf32, #tpu.memory_space<vmem>>, vector<1x128xf32>
    %7 = vector.broadcast %6 : vector<1x128xf32> to vector<16x128xf32>
    %8 = arith.addf %5, %7 : vector<16x128xf32>
    %c0_6 = arith.constant 0 : index
    %c0_7 = arith.constant 0 : index
    %9 = vector.load %arg5[%c0_6, %c0_7] : memref<1x128xf32, #tpu.memory_space<vmem>>, vector<1x128xf32>
    %10 = vector.broadcast %9 : vector<1x128xf32> to vector<16x128xf32>
    %11 = arith.cmpf ogt, %8, %10 : vector<16x128xf32>
    %cst_8 = arith.constant 0.000000e+00 : f32
    %12 = vector.broadcast %cst_8 : f32 to vector<16x128xf32>
    %13 = arith.select %11, %8, %12 : vector<16x128xi1>, vector<16x128xf32>
    %c0_9 = arith.constant 0 : index
    %c0_10 = arith.constant 0 : index
    %14 = vector.load %arg9[%c0_9, %c0_10] : memref<16x128xf32, #tpu.memory_space<vmem>>, vector<16x128xf32>
    %c0_11 = arith.constant 0 : index
    %c0_12 = arith.constant 0 : index
    %15 = vector.load %arg6[%c0_11, %c0_12] : memref<128x128xf32, #tpu.memory_space<vmem>>, vector<128x128xf32>
    %cst_13 = arith.constant dense<0.000000e+00> : vector<16x128xf32>
    %16 = tpu.matmul %13, %15, %cst_13 {dimension_numbers = #tpu.dot_dimension_numbers<[1], [0], [0], [1], [0, 0, 1, 1], [], []>} : vector<16x128xf32>, vector<128x128xf32>, vector<16x128xf32> -> vector<16x128xf32>
    %17 = arith.addf %14, %16 : vector<16x128xf32>
    %c0_14 = arith.constant 0 : index
    %c0_15 = arith.constant 0 : index
    %18 = vector.load %arg9[%c0_14, %c0_15] : memref<16x128xf32, #tpu.memory_space<vmem>>, vector<16x128xf32>
    tpu.vector_store %arg9[%c0_14, %c0_15], %17 {strides = array<i32>} : memref<16x128xf32, #tpu.memory_space<vmem>>, vector<16x128xf32>,
    %c0_i32_16 = arith.constant 0 : i32
    %19 = arith.cmpi eq, %arg1, %c0_i32_16 : i32
    %20 = arith.extui %19 : i1 to i32
    %c0_i32_17 = arith.constant 0 : i32
    %21 = arith.cmpi ne, %20, %c0_i32_17 : i32
    scf.if %21 {
      %c0_18 = arith.constant 0 : index
      %c0_19 = arith.constant 0 : index
      %22 = vector.load %arg9[%c0_18, %c0_19] : memref<16x128xf32, #tpu.memory_space<vmem>>, vector<16x128xf32>
      %c0_20 = arith.constant 0 : index
      %c0_21 = arith.constant 0 : index
      %23 = vector.load %arg8[%c0_20, %c0_21] : memref<16x128xf32, #tpu.memory_space<vmem>>, vector<16x128xf32>
      tpu.vector_store %arg8[%c0_20, %c0_21], %22 {strides = array<i32>} : memref<16x128xf32, #tpu.memory_space<vmem>>, vector<16x128xf32>,
    } else {
    }
    return
  }
  func.func @transform_0(%arg0: i32, %arg1: i32) -> (i32, i32) {
    %c0_i32 = arith.constant 0 : i32
    %c0_i32_0 = arith.constant 0 : i32
    return %arg0, %c0_i32 : i32, i32
  }
  func.func @transform_1(%arg0: i32, %arg1: i32) -> (i32, i32) {
    %c0_i32 = arith.constant 0 : i32
    %c0_i32_0 = arith.constant 0 : i32
    return %c0_i32, %arg1 : i32, i32
  }
  func.func @transform_2(%arg0: i32, %arg1: i32) -> (i32, i32) {
    %c0_i32 = arith.constant 0 : i32
    %c0_i32_0 = arith.constant 0 : i32
    return %c0_i32, %arg1 : i32, i32
  }
  func.func @transform_3(%arg0: i32, %arg1: i32) -> (i32, i32) {
    %c0_i32 = arith.constant 0 : i32
    %c0_i32_0 = arith.constant 0 : i32
    return %c0_i32, %arg1 : i32, i32
  }
  func.func @transform_4(%arg0: i32, %arg1: i32) -> (i32, i32) {
    %c0_i32 = arith.constant 0 : i32
    %c0_i32_0 = arith.constant 0 : i32
    return %arg1, %c0_i32 : i32, i32
  }
  func.func @transform_5(%arg0: i32, %arg1: i32) -> (i32, i32) {
    %c0_i32 = arith.constant 0 : i32
    %c0_i32_0 = arith.constant 0 : i32
    %c0_i32_1 = arith.constant 0 : i32
    return %c0_i32, %c0_i32_0 : i32, i32
  }
  func.func @transform_6(%arg0: i32, %arg1: i32) -> (i32, i32) {
    %c0_i32 = arith.constant 0 : i32
    %c0_i32_0 = arith.constant 0 : i32
    return %arg0, %c0_i32 : i32, i32
  }
}

</mosaic_0001>

<bundles_post_ra>
// kernel: _forward_impl.1
= control target key start
LH: loop header
LB: loop body
LE: loop exit
PB: predicated region body
PF: predicated region fallthrough
CT: control target
= control target key end

     0   :  { %s375_s0 = inlined_call_operand.vmem [shape: f32[16,128], index: 0, kind: input, shape index: {}]   ;;  %s376_s1 = inlined_call_operand.vmem [shape: f32[128,128], index: 1, kind: input, shape index: {}]   ;;  %s377_s2 = inlined_call_operand.vmem [shape: f32[1,128], index: 2, kind: input, shape index: {}]   ;;  %s378_s3 = inlined_call_operand.vmem [shape: f32[1,128], index: 3, kind: input, shape index: {}]   ;;  %s379_s4 = inlined_call_operand.vmem [shape: f32[128,128], index: 4, kind: input, shape index: {}]   ;;  %s380_s5 = inlined_call_operand.vmem [shape: f32[1,128], index: 5, kind: input, shape index: {}]   ;;  %s381_s6 = inlined_call_operand.hbm [shape: f32[16,128], index: 6, kind: output, shape index: {}]  }
   0x1   :  { %v51_v0 = vld [vmem:[%s376_s1 + $0x78] sm:$0xff]  ;;  %v50_v1 = vld [vmem:[%s376_s1 + $0x70] sm:$0xff]  ;;  %v49_v2 = vld [vmem:[%s376_s1 + $0x68] sm:$0xff] }
   0x2   :  { %159 = vmatpush.msra.mxu2 %v51_v0  ;;  %56 = vmatpush.msra.mxu0 %v51_v0  ;;  %v48_v3 = vld [vmem:[%s376_s1 + $0x60] sm:$0xff]  ;;  %v47_v4 = vld [vmem:[%s376_s1 + $0x58] sm:$0xff]  ;;  %v103_v6 = vld [vmem:[%s379_s4 + $0x70] sm:$0xff] }
   0x3   :  { %v104_v5 = vld [vmem:[%s379_s4 + $0x78] sm:$0xff]  ;;  %v46_v7 = vld [vmem:[%s376_s1 + $0x50] sm:$0xff]  ;;  %v102_v8 = vld [vmem:[%s379_s4 + $0x68] sm:$0xff] }
   0x4   :  { %160 = vmatpush.msra.mxu2 %v50_v1  ;;  %57 = vmatpush.msra.mxu0 %v50_v1  ;;  %v45_v9 = vld [vmem:[%s376_s1 + $0x48] sm:$0xff]  ;;  %v101_v10 = vld [vmem:[%s379_s4 + $0x60] sm:$0xff] }
   0x5   :  { %175 = vmatpush.msra.mxu3 %v104_v5  ;;  %105 = vmatpush.msra.mxu1 %v104_v5  ;;  %v44_v11 = vld [vmem:[%s376_s1 + $0x40] sm:$0xff] }
   0x6   :  { %161 = vmatpush.msra.mxu2 %v49_v2  ;;  %58 = vmatpush.msra.mxu0 %v49_v2 }
   0x7   :  { %176 = vmatpush.msra.mxu3 %v103_v6  ;;  %106 = vmatpush.msra.mxu1 %v103_v6 }
   0x8   :  { %162 = vmatpush.msra.mxu2 %v48_v3  ;;  %59 = vmatpush.msra.mxu0 %v48_v3 }
   0x9   :  { %177 = vmatpush.msra.mxu3 %v102_v8  ;;  %107 = vmatpush.msra.mxu1 %v102_v8 }
   0xa   :  { %163 = vmatpush.msra.mxu2 %v47_v4  ;;  %60 = vmatpush.msra.mxu0 %v47_v4 }
   0xc   :  { %164 = vmatpush.msra.mxu2 %v46_v7  ;;  %61 = vmatpush.msra.mxu0 %v46_v7 }
   0xd   :  { %11 = vsyncpa [#allocation4], 0  ;;  %v100_v12 = vld [vmem:[%s379_s4 + $0x58] sm:$0xff]  ;;  %178 = vmatpush.msra.mxu3 %v101_v10  ;;  %108 = vmatpush.msra.mxu1 %v101_v10  ;;  %v99_v14 = vld [vmem:[%s379_s4 + $0x50] sm:$0xff]  ;;  %s224_s23 = smov 128   ;;  %s225_s24 = smov 8  }
   0xe   :  { %165 = vmatpush.msra.mxu2 %v45_v9  ;;  %62 = vmatpush.msra.mxu0 %v45_v9  ;;  %v43_v13 = vld [vmem:[%s376_s1 + $0x38] sm:$0xff]  ;;  %v42_v15 = vld [vmem:[%s376_s1 + $0x30] sm:$0xff]  ;;  %v98_v16 = vld [vmem:[%s379_s4 + $0x48] sm:$0xff] }
   0xf   :  { %179 = vmatpush.msra.mxu3 %v100_v12  ;;  %109 = vmatpush.msra.mxu1 %v100_v12  ;;  %v41_v17 = vld [vmem:[%s376_s1 + $0x28] sm:$0xff]  ;;  %v97_v18 = vld [vmem:[%s379_s4 + $0x40] sm:$0xff]  ;;  %v96_v20 = vld [vmem:[%s379_s4 + $0x38] sm:$0xff] }
  0x10   :  { %166 = vmatpush.msra.mxu2 %v44_v11  ;;  %63 = vmatpush.msra.mxu0 %v44_v11  ;;  %v40_v19 = vld [vmem:[%s376_s1 + $0x20] sm:$0xff]  ;;  %v39_v21 = vld [vmem:[%s376_s1 + $0x18] sm:$0xff]  ;;  %v95_v22 = vld [vmem:[%s379_s4 + $0x30] sm:$0xff] }
  0x11   :  { %180 = vmatpush.msra.mxu3 %v99_v14  ;;  %110 = vmatpush.msra.mxu1 %v99_v14  ;;  %v38_v23 = vld [vmem:[%s376_s1 + $0x10] sm:$0xff]  ;;  %v94_v24 = vld [vmem:[%s379_s4 + $0x28] sm:$0xff]  ;;  %v93_v26 = vld [vmem:[%s379_s4 + $0x20] sm:$0xff] }
  0x12   :  { %167 = vmatpush.msra.mxu2 %v43_v13  ;;  %64 = vmatpush.msra.mxu0 %v43_v13  ;;  %v37_v25 = vld [vmem:[%s376_s1 + $0x8] sm:$0xff]  ;;  %v36_v27 = vld [vmem:[%s376_s1] sm:$0xff]  ;;  %v92_v30 = vld [vmem:[%s379_s4 + $0x18] sm:$0xff] }
  0x13   :  { %181 = vmatpush.msra.mxu3 %v98_v16  ;;  %111 = vmatpush.msra.mxu1 %v98_v16  ;;  %v35_v28 = vld [vmem:[%s375_s0 + $0x8] sm:$0xff]  ;;  %v34_v29 = vld [vmem:[%s375_s0] sm:$0xff]  ;;  %v91_v31 = vld [vmem:[%s379_s4 + $0x10] sm:$0xff] }
  0x14   :  { %168 = vmatpush.msra.mxu2 %v42_v15  ;;  %65 = vmatpush.msra.mxu0 %v42_v15  ;;  %v90_v32 = vld [vmem:[%s379_s4 + $0x8] sm:$0xff]  ;;  %v89_v33 = vld [vmem:[%s379_s4] sm:$0xff] }
  0x15   :  { %182 = vmatpush.msra.mxu3 %v97_v18  ;;  %112 = vmatpush.msra.mxu1 %v97_v18  ;;  %v194_v34 = vld [vmem:[%s377_s2] ss:$0 sm:$0xff]  ;;  %s223_s2 = smov [#allocation3]  }
  0x16   :  { %169 = vmatpush.msra.mxu2 %v41_v17  ;;  %66 = vmatpush.msra.mxu0 %v41_v17  ;;  %v195_v36 = vld [vmem:[%s378_s3] ss:$0 sm:$0xff]  ;;  %s143_s20 = sshll.u32 %s223_s2, 4  ;;  %s145_s3 = sshll.u32 %s381_s6, 4  ;;  %s144_s20 = int_to_ptr.vmem [resolvable:$true] %s143_s20  ;;  %s146_s3 = int_to_ptr.hbm [resolvable:$true] %s145_s3 }
  0x17   :  { %183 = vmatpush.msra.mxu3 %v96_v20  ;;  %113 = vmatpush.msra.mxu1 %v96_v20  ;;  %v196_v40 = vld [vmem:[%s380_s5] ss:$0 sm:$0xff] }
  0x18   :  { %170 = vmatpush.msra.mxu2 %v40_v19  ;;  %67 = vmatpush.msra.mxu0 %v40_v19 }
  0x19   :  { %184 = vmatpush.msra.mxu3 %v95_v22  ;;  %114 = vmatpush.msra.mxu1 %v95_v22 }
  0x1a   :  { %171 = vmatpush.msra.mxu2 %v39_v21  ;;  %68 = vmatpush.msra.mxu0 %v39_v21 }
  0x1b   :  { %185 = vmatpush.msra.mxu3 %v94_v24  ;;  %115 = vmatpush.msra.mxu1 %v94_v24 }
  0x1c   :  { %172 = vmatpush.msra.mxu2 %v38_v23  ;;  %69 = vmatpush.msra.mxu0 %v38_v23 }
  0x1d   :  { %186 = vmatpush.msra.mxu3 %v93_v26  ;;  %116 = vmatpush.msra.mxu1 %v93_v26 }
  0x1e   :  { %173 = vmatpush.msra.mxu2 %v37_v25  ;;  %70 = vmatpush.msra.mxu0 %v37_v25 }
  0x1f   :  { %187 = vmatpush.msra.mxu3 %v92_v30  ;;  %117 = vmatpush.msra.mxu1 %v92_v30 }
  0x20   :  { %174 = vmatpush.msra.mxu2 %v36_v27  ;;  %71 = vmatpush.msra.mxu0 %v36_v27 }
  0x21   :  { %75 = vmatmul.f32.vlgmr.msra.gmra.mxu2 %v35_v28  ;;  %72 = vmatmul.f32.vlgmr.msra.gmra.mxu0 %v34_v29 }
  0x22   :  { %188 = vmatpush.msra.mxu3 %v91_v31  ;;  %118 = vmatpush.msra.mxu1 %v91_v31 }
  0x24   :  { %189 = vmatpush.msra.mxu3 %v90_v32  ;;  %119 = vmatpush.msra.mxu1 %v90_v32 }
  0x26   :  { %190 = vmatpush.msra.mxu3 %v89_v33  ;;  %120 = vmatpush.msra.mxu1 %v89_v33 }
  0x9e   :  { %v73_v35 = vpop.f32.mrf.mxu0 }
  0x9f   :  { %v74_v37 = vadd.f32 %v194_v34, %v73_v35 }
  0xa1   :  { %vm83_vm0 = vcmp.gt.f32.partialorder %v74_v37, %v195_v36 }
  0xa2   :  { %157 = vmatmul.msk.f32.vlgmr.msra.gmra.mxu1 %vm83_vm0, %v74_v37 }
  0xa4   :  { %v76_v38 = vpop.f32.mrf.mxu2 }
  0xa5   :  { %v77_v39 = vadd.f32 %v194_v34, %v76_v38 }
  0xa7   :  { %vm84_vm1 = vcmp.gt.f32.partialorder %v77_v39, %v195_v36 }
  0xa8   :  { %158 = vmatmul.msk.f32.vlgmr.msra.gmra.mxu3 %vm84_vm1, %v77_v39 }
 0x11f   :  { %v122_v41 = vpop.f32.mrf.mxu1 }
 0x120   :  { %v128_v42 = vadd.f32 %v196_v40, %v122_v41 }
 0x122   :  { %137 = vst [vmem:[#allocation3] sm:$0xff] %v128_v42 }
 0x12b   :  { %v125_v43 = vpop.f32.mrf.mxu3 }
 0x12c   :  { %v129_v44 = vadd.f32 %v196_v40, %v125_v43 }
 0x12e   :  { %138 = vst [vmem:[#allocation3 + $0x8] sm:$0xff] %v129_v44 }
 0x12f   :  { %151 = dma.vmem_to_hbm [thread:$0]  %s144_s20, 256, %s146_s3, [#allocation4], %s224_s23, %s224_s23, %s225_s24  }
 0x130   :  { %221 = dma.done.wait [#allocation4], 256  }
 0x131   :  { %222 = vsyncadd [#allocation4], 4294967040 }
 0x132   :  { %156 = vsyncpa [#allocation4], 1 }

</bundles_post_ra>
